<compile_context>
chip_gen: v5e
topology: v5e:2x2
jax: 0.10.0
libtpu: 0.0.40
codegen_flags: <defaults>
</compile_context>

<pallas_src>
import functools

import jax
import jax.numpy as jnp
import numpy as np
from jax.experimental import pallas as pl
from jax.experimental.pallas import tpu as pltpu


def _conv3x3_relu_kernel(x_ref, w_ref, b_ref, mask_ref, o_ref, col_ref, *, H, W):
    """One grid step = one batch block of NB elements.

    x_ref:    (R, HW)          R = NB*Cin input rows, ordered (n, cin)
    w_ref:    (NB*Cout, 9*R)   block-diagonal expanded weights, K = (tap, n, cin)
    b_ref:    (NB*Cout, 1)     bias tiled over the batch block
    mask_ref: (9, HW)          1.0 where tap (kh, kw) is in-bounds, else 0.0
    o_ref:    (NB*Cout, HW)    output rows ordered (n, cout)
    col_ref:  (9*R, HW)        VMEM scratch: im2col slab
    """
    HW = H * W
    R = x_ref.shape[0]

    xall = x_ref[...]          # (R, HW): loaded once, every roll reuses it
    masks = mask_ref[...]      # (9, HW)

    # Build the im2col slab.  Tap t = kh*3+kw is the whole (R, HW) block shifted
    # by (dy, dx) along the flat spatial (lane) axis; padding positions are
    # zeroed by the mask.  R is 8-aligned, so every store below is a full,
    # unmasked sublane-aligned vst at offset t*R.
    for kh in range(3):
        dy = kh - 1
        for kw in range(3):
            dx = kw - 1
            t = kh * 3 + kw
            shift = (-(dy * W + dx)) % HW
            shifted = xall if shift == 0 else pltpu.roll(xall, shift, axis=1)
            if dy == 0 and dx == 0:
                tap = shifted                       # center tap: mask is all ones
            else:
                tap = shifted * masks[t:t + 1, :]   # (R, HW)
            col_ref[t * R:(t + 1) * R, :] = tap

    # ONE MXU matmul for the whole batch block, lane-dense output.
    acc = jnp.dot(w_ref[...], col_ref[...], preferred_element_type=jnp.float32)
    acc = acc + b_ref[...]                                   # bias over lanes
    o_ref[...] = jnp.maximum(acc, 0.0).astype(o_ref.dtype)   # ReLU + store


def _tap_masks(H, W):
    """(9, H*W) f32 validity masks for the 3x3 taps with padding=1."""
    HW = H * W
    ys, xs = np.meshgrid(np.arange(H), np.arange(W), indexing="ij")
    ys = ys.reshape(HW)
    xs = xs.reshape(HW)
    m = np.zeros((9, HW), dtype=np.float32)
    for kh in range(3):
        for kw in range(3):
            dy, dx = kh - 1, kw - 1
            m[kh * 3 + kw] = ((ys + dy >= 0) & (ys + dy < H) &
                              (xs + dx >= 0) & (xs + dx < W))
    return jnp.asarray(m)


def _pick_batch_block(N, Cin, Cout):
    """Smallest divisor NB of N that makes both NB*Cin and NB*Cout 8-aligned
    (unmasked sublane stores + always-legal BlockSpecs).  Fall back to the
    whole batch in one step (block == full array is always legal)."""
    for nb in range(1, N):
        if N % nb == 0 and (nb * Cin) % 8 == 0 and (nb * Cout) % 8 == 0:
            return nb
    return N


@jax.jit
def single_conv_forward(x_nchw, weight, bias):
    """Conv2d(k=3, s=1, p=1) + ReLU.  x: (N,Cin,H,W); weight: (Cout,Cin,3,3)."""
    N, Cin, H, W = x_nchw.shape
    Cout = weight.shape[0]
    HW = H * W

    NB = _pick_batch_block(N, Cin, Cout)      # = 2 for the test shape
    R = NB * Cin                              # = 8 -> sublane-aligned slab rows
    G = N // NB                               # grid steps (= 1 here)

    x_flat = x_nchw.reshape(N * Cin, HW)      # FREE reshape (rows ordered n,cin)

    # (Cout, Cin, 3, 3) -> (Cout, 9, Cin); K ordered (kh, kw, cin).
    w_mat = jnp.transpose(weight, (0, 2, 3, 1)).reshape(Cout, 9, Cin)
    # Block-diagonal expansion over the NB batch elements of one grid step:
    #   w_exp[n*Cout+co, t*R + m*Cin + c] = w_mat[co, t, c] * (n == m)
    w_exp = jnp.einsum("otc,nm->notmc", w_mat, jnp.eye(NB, dtype=w_mat.dtype))
    w_exp = w_exp.reshape(NB * Cout, 9 * R)
    b_exp = jnp.tile(bias.reshape(1, Cout), (NB, 1)).reshape(NB * Cout, 1)

    masks = _tap_masks(H, W)

    kernel = functools.partial(_conv3x3_relu_kernel, H=H, W=W)

    out_flat = pl.pallas_call(
        kernel,
        out_shape=jax.ShapeDtypeStruct((N * Cout, HW), x_nchw.dtype),
        grid_spec=pltpu.PrefetchScalarGridSpec(
            num_scalar_prefetch=0,
            grid=(G,),
            in_specs=[
                pl.BlockSpec((R, HW), lambda g: (g, 0)),            # x block
                pl.BlockSpec((NB * Cout, 9 * R), lambda g: (0, 0)),  # weights
                pl.BlockSpec((NB * Cout, 1), lambda g: (0, 0)),      # bias
                pl.BlockSpec((9, HW), lambda g: (0, 0)),             # masks
            ],
            out_specs=pl.BlockSpec((NB * Cout, HW), lambda g: (g, 0)),
            scratch_shapes=[pltpu.VMEM((9 * R, HW), jnp.float32)],
        ),
        compiler_params=pltpu.CompilerParams(
            dimension_semantics=("parallel",),   # shards batch blocks over TCs
        ),
    )(x_flat, w_exp, b_exp, masks)

    return out_flat.reshape(N, Cout, H, W)     # FREE reshape (rows are n,cout)


if __name__ == "__main__":
    key = jax.random.PRNGKey(0)
    k_x, k_w, k_b = jax.random.split(key, 3)

    N, Cin, Cout, H, W = 2, 4, 8, 16, 16

    x = jax.random.normal(k_x, (N, Cin, H, W), dtype=jnp.float32)
    # Deterministic param init mimicking PyTorch Conv2d default (+/- 1/sqrt(fan_in))
    fan_in = Cin * 3 * 3
    bound = 1.0 / (fan_in ** 0.5)
    weight = jax.random.uniform(k_w, (Cout, Cin, 3, 3), jnp.float32, -bound, bound)
    bias = jax.random.uniform(k_b, (Cout,), jnp.float32, -bound, bound)

    out = single_conv_forward(x, weight, bias)
    out = jax.block_until_ready(out)

    # Reference check against XLA's conv (same semantics as nn.Conv2d + ReLU)
    ref = jax.lax.conv_general_dilated(
        x, weight, window_strides=(1, 1), padding=((1, 1), (1, 1)),
        dimension_numbers=("NCHW", "OIHW", "NCHW"),
    ) + bias.reshape(1, Cout, 1, 1)
    ref = jnp.maximum(ref, 0.0)
    assert out.shape == (N, Cout, H, W)
    assert jnp.allclose(out, ref, atol=1e-4, rtol=1e-4)

    print("KERNEL_OK")
</pallas_src>

<mosaic_0001>
module attributes {stable_mosaic.version = 11 : i64} {
  func.func @_conv3x3_relu_kernel(%arg0: i32, %arg1: memref<8x256xf32, #tpu.memory_space<vmem>>, %arg2: memref<16x72xf32, #tpu.memory_space<vmem>>, %arg3: memref<16x1xf32, #tpu.memory_space<vmem>>, %arg4: memref<9x256xf32, #tpu.memory_space<vmem>>, %arg5: memref<16x256xf32, #tpu.memory_space<vmem>>, %arg6: memref<72x256xf32, #tpu.memory_space<vmem>>) attributes {dimension_semantics = [#tpu.dimension_semantics<parallel>], iteration_bounds = array<i64: 1>, scalar_prefetch = 0 : i64, scratch_operands = 1 : i64, tpu.core_type = #tpu.core_type<tc>, window_params = [{transform_indices = @transform_0, window_bounds = array<i64: 8, 256>}, {pipeline_mode = #tpu.pipeline_mode<synchronous>, transform_indices = @transform_1, window_bounds = array<i64: 16, 72>}, {pipeline_mode = #tpu.pipeline_mode<synchronous>, transform_indices = @transform_2, window_bounds = array<i64: 16, 1>}, {pipeline_mode = #tpu.pipeline_mode<synchronous>, transform_indices = @transform_3, window_bounds = array<i64: 9, 256>}, {transform_indices = @transform_4, window_bounds = array<i64: 16, 256>}]} {
    %c0 = arith.constant 0 : index
    %c0_0 = arith.constant 0 : index
    %0 = vector.load %arg1[%c0, %c0_0] : memref<8x256xf32, #tpu.memory_space<vmem>>, vector<8x256xf32>
    %c0_1 = arith.constant 0 : index
    %c0_2 = arith.constant 0 : index
    %1 = vector.load %arg4[%c0_1, %c0_2] : memref<9x256xf32, #tpu.memory_space<vmem>>, vector<9x256xf32>
    %c17_i32 = arith.constant 17 : i32
    %2 = tpu.dynamic_rotate %0 by %c17_i32 dim 1 : vector<8x256xf32>, i32 -> vector<8x256xf32>
    %3 = vector.extract_strided_slice %1 {offsets = [0, 0], sizes = [1, 256], strides = [1, 1]} : vector<9x256xf32> to vector<1x256xf32>
    %4 = vector.broadcast %3 : vector<1x256xf32> to vector<8x256xf32>
    %5 = arith.mulf %2, %4 : vector<8x256xf32>
    %c0_3 = arith.constant 0 : index
    %c0_4 = arith.constant 0 : index
    %6 = vector.load %arg6[%c0_3, %c0_4] : memref<72x256xf32, #tpu.memory_space<vmem>>, vector<8x256xf32>
    tpu.vector_store %arg6[%c0_3, %c0_4], %5 {strides = array<i32>} : memref<72x256xf32, #tpu.memory_space<vmem>>, vector<8x256xf32>,
    %c16_i32 = arith.constant 16 : i32
    %7 = tpu.dynamic_rotate %0 by %c16_i32 dim 1 : vector<8x256xf32>, i32 -> vector<8x256xf32>
    %8 = vector.extract_strided_slice %1 {offsets = [1, 0], sizes = [1, 256], strides = [1, 1]} : vector<9x256xf32> to vector<1x256xf32>
    %9 = vector.broadcast %8 : vector<1x256xf32> to vector<8x256xf32>
    %10 = arith.mulf %7, %9 : vector<8x256xf32>
    %c8 = arith.constant 8 : index
    %c0_5 = arith.constant 0 : index
    %11 = vector.load %arg6[%c8, %c0_5] : memref<72x256xf32, #tpu.memory_space<vmem>>, vector<8x256xf32>
    tpu.vector_store %arg6[%c8, %c0_5], %10 {strides = array<i32>} : memref<72x256xf32, #tpu.memory_space<vmem>>, vector<8x256xf32>,
    %c15_i32 = arith.constant 15 : i32
    %12 = tpu.dynamic_rotate %0 by %c15_i32 dim 1 : vector<8x256xf32>, i32 -> vector<8x256xf32>
    %13 = vector.extract_strided_slice %1 {offsets = [2, 0], sizes = [1, 256], strides = [1, 1]} : vector<9x256xf32> to vector<1x256xf32>
    %14 = vector.broadcast %13 : vector<1x256xf32> to vector<8x256xf32>
    %15 = arith.mulf %12, %14 : vector<8x256xf32>
    %c16 = arith.constant 16 : index
    %c0_6 = arith.constant 0 : index
    %16 = vector.load %arg6[%c16, %c0_6] : memref<72x256xf32, #tpu.memory_space<vmem>>, vector<8x256xf32>
    tpu.vector_store %arg6[%c16, %c0_6], %15 {strides = array<i32>} : memref<72x256xf32, #tpu.memory_space<vmem>>, vector<8x256xf32>,
    %c1_i32 = arith.constant 1 : i32
    %17 = tpu.dynamic_rotate %0 by %c1_i32 dim 1 : vector<8x256xf32>, i32 -> vector<8x256xf32>
    %18 = vector.extract_strided_slice %1 {offsets = [3, 0], sizes = [1, 256], strides = [1, 1]} : vector<9x256xf32> to vector<1x256xf32>
    %19 = vector.broadcast %18 : vector<1x256xf32> to vector<8x256xf32>
    %20 = arith.mulf %17, %19 : vector<8x256xf32>
    %c24 = arith.constant 24 : index
    %c0_7 = arith.constant 0 : index
    %21 = vector.load %arg6[%c24, %c0_7] : memref<72x256xf32, #tpu.memory_space<vmem>>, vector<8x256xf32>
    tpu.vector_store %arg6[%c24, %c0_7], %20 {strides = array<i32>} : memref<72x256xf32, #tpu.memory_space<vmem>>, vector<8x256xf32>,
    %c32 = arith.constant 32 : index
    %c0_8 = arith.constant 0 : index
    %22 = vector.load %arg6[%c32, %c0_8] : memref<72x256xf32, #tpu.memory_space<vmem>>, vector<8x256xf32>
    tpu.vector_store %arg6[%c32, %c0_8], %0 {strides = array<i32>} : memref<72x256xf32, #tpu.memory_space<vmem>>, vector<8x256xf32>,
    %c255_i32 = arith.constant 255 : i32
    %23 = tpu.dynamic_rotate %0 by %c255_i32 dim 1 : vector<8x256xf32>, i32 -> vector<8x256xf32>
    %24 = vector.extract_strided_slice %1 {offsets = [5, 0], sizes = [1, 256], strides = [1, 1]} : vector<9x256xf32> to vector<1x256xf32>
    %25 = vector.broadcast %24 : vector<1x256xf32> to vector<8x256xf32>
    %26 = arith.mulf %23, %25 : vector<8x256xf32>
    %c40 = arith.constant 40 : index
    %c0_9 = arith.constant 0 : index
    %27 = vector.load %arg6[%c40, %c0_9] : memref<72x256xf32, #tpu.memory_space<vmem>>, vector<8x256xf32>
    tpu.vector_store %arg6[%c40, %c0_9], %26 {strides = array<i32>} : memref<72x256xf32, #tpu.memory_space<vmem>>, vector<8x256xf32>,
    %c241_i32 = arith.constant 241 : i32
    %28 = tpu.dynamic_rotate %0 by %c241_i32 dim 1 : vector<8x256xf32>, i32 -> vector<8x256xf32>
    %29 = vector.extract_strided_slice %1 {offsets = [6, 0], sizes = [1, 256], strides = [1, 1]} : vector<9x256xf32> to vector<1x256xf32>
    %30 = vector.broadcast %29 : vector<1x256xf32> to vector<8x256xf32>
    %31 = arith.mulf %28, %30 : vector<8x256xf32>
    %c48 = arith.constant 48 : index
    %c0_10 = arith.constant 0 : index
    %32 = vector.load %arg6[%c48, %c0_10] : memref<72x256xf32, #tpu.memory_space<vmem>>, vector<8x256xf32>
    tpu.vector_store %arg6[%c48, %c0_10], %31 {strides = array<i32>} : memref<72x256xf32, #tpu.memory_space<vmem>>, vector<8x256xf32>,
    %c240_i32 = arith.constant 240 : i32
    %33 = tpu.dynamic_rotate %0 by %c240_i32 dim 1 : vector<8x256xf32>, i32 -> vector<8x256xf32>
    %34 = vector.extract_strided_slice %1 {offsets = [7, 0], sizes = [1, 256], strides = [1, 1]} : vector<9x256xf32> to vector<1x256xf32>
    %35 = vector.broadcast %34 : vector<1x256xf32> to vector<8x256xf32>
    %36 = arith.mulf %33, %35 : vector<8x256xf32>
    %c56 = arith.constant 56 : index
    %c0_11 = arith.constant 0 : index
    %37 = vector.load %arg6[%c56, %c0_11] : memref<72x256xf32, #tpu.memory_space<vmem>>, vector<8x256xf32>
    tpu.vector_store %arg6[%c56, %c0_11], %36 {strides = array<i32>} : memref<72x256xf32, #tpu.memory_space<vmem>>, vector<8x256xf32>,
    %c239_i32 = arith.constant 239 : i32
    %38 = tpu.dynamic_rotate %0 by %c239_i32 dim 1 : vector<8x256xf32>, i32 -> vector<8x256xf32>
    %39 = vector.extract_strided_slice %1 {offsets = [8, 0], sizes = [1, 256], strides = [1, 1]} : vector<9x256xf32> to vector<1x256xf32>
    %40 = vector.broadcast %39 : vector<1x256xf32> to vector<8x256xf32>
    %41 = arith.mulf %38, %40 : vector<8x256xf32>
    %c64 = arith.constant 64 : index
    %c0_12 = arith.constant 0 : index
    %42 = vector.load %arg6[%c64, %c0_12] : memref<72x256xf32, #tpu.memory_space<vmem>>, vector<8x256xf32>
    tpu.vector_store %arg6[%c64, %c0_12], %41 {strides = array<i32>} : memref<72x256xf32, #tpu.memory_space<vmem>>, vector<8x256xf32>,
    %c0_13 = arith.constant 0 : index
    %c0_14 = arith.constant 0 : index
    %43 = vector.load %arg2[%c0_13, %c0_14] : memref<16x72xf32, #tpu.memory_space<vmem>>, vector<16x72xf32>
    %c0_15 = arith.constant 0 : index
    %c0_16 = arith.constant 0 : index
    %44 = vector.load %arg6[%c0_15, %c0_16] : memref<72x256xf32, #tpu.memory_space<vmem>>, vector<72x256xf32>
    %cst = arith.constant dense<0.000000e+00> : vector<16x256xf32>
    %45 = tpu.matmul %43, %44, %cst {dimension_numbers = #tpu.dot_dimension_numbers<[1], [0], [0], [1], [0, 0, 1, 1], [], []>} : vector<16x72xf32>, vector<72x256xf32>, vector<16x256xf32> -> vector<16x256xf32>
    %c0_17 = arith.constant 0 : index
    %c0_18 = arith.constant 0 : index
    %46 = vector.load %arg3[%c0_17, %c0_18] : memref<16x1xf32, #tpu.memory_space<vmem>>, vector<16x1xf32>
    %47 = vector.broadcast %46 : vector<16x1xf32> to vector<16x256xf32>
    %48 = arith.addf %45, %47 : vector<16x256xf32>
    %cst_19 = arith.constant 0.000000e+00 : f32
    %49 = vector.broadcast %cst_19 : f32 to vector<16x256xf32>
    %50 = arith.maximumf %48, %49 : vector<16x256xf32>
    %c0_20 = arith.constant 0 : index
    %c0_21 = arith.constant 0 : index
    %51 = vector.load %arg5[%c0_20, %c0_21] : memref<16x256xf32, #tpu.memory_space<vmem>>, vector<16x256xf32>
    tpu.vector_store %arg5[%c0_20, %c0_21], %50 {strides = array<i32>} : memref<16x256xf32, #tpu.memory_space<vmem>>, vector<16x256xf32>,
    return
  }
  func.func @transform_0(%arg0: i32) -> (i32, i32) {
    %c0_i32 = arith.constant 0 : i32
    %c0_i32_0 = arith.constant 0 : i32
    return %arg0, %c0_i32 : i32, i32
  }
  func.func @transform_1(%arg0: i32) -> (i32, i32) {
    %c0_i32 = arith.constant 0 : i32
    %c0_i32_0 = arith.constant 0 : i32
    %c0_i32_1 = arith.constant 0 : i32
    return %c0_i32, %c0_i32_0 : i32, i32
  }
  func.func @transform_2(%arg0: i32) -> (i32, i32) {
    %c0_i32 = arith.constant 0 : i32
    %c0_i32_0 = arith.constant 0 : i32
    %c0_i32_1 = arith.constant 0 : i32
    return %c0_i32, %c0_i32_0 : i32, i32
  }
  func.func @transform_3(%arg0: i32) -> (i32, i32) {
    %c0_i32 = arith.constant 0 : i32
    %c0_i32_0 = arith.constant 0 : i32
    %c0_i32_1 = arith.constant 0 : i32
    return %c0_i32, %c0_i32_0 : i32, i32
  }
  func.func @transform_4(%arg0: i32) -> (i32, i32) {
    %c0_i32 = arith.constant 0 : i32
    %c0_i32_0 = arith.constant 0 : i32
    return %arg0, %c0_i32 : i32, i32
  }
}

</mosaic_0001>

<bundles_post_ra>
// kernel: tile.6
= control target key start
LH: loop header
LB: loop body
LE: loop exit
PB: predicated region body
PF: predicated region fallthrough
CT: control target
= control target key end

     0   :  { %s22_s0 = inlined_call_operand.vmem [shape: f32[8], index: 0, kind: input, shape index: {}]   ;;  %s23_s1 = inlined_call_operand.vmem [shape: f32[2,1,1,8], index: 1, kind: output, shape index: {}]  }
   0x1   :  { %v4_v0 = vld [vmem:[%s22_s0] ss:$0 sm:$0xff] }
   0x2   :  { %5 = vst [vmem:[%s23_s1] sm:$0x3] %v4_v0 }

// kernel: tile.0
= control target key start
LH: loop header
LB: loop body
LE: loop exit
PB: predicated region body
PF: predicated region fallthrough
CT: control target
= control target key end

     0   :  { %s66_s8 = smov 125   ;;  %s67_s9 = smov 123   ;;  %vm7_vm0 = vcmask 7168   ;;  %s117_s0 = inlined_call_operand.vmem [shape: f32[2,1,1,8], index: 0, kind: input, shape index: {}]   ;;  %s118_s1 = inlined_call_operand.vmem [shape: f32[16,1], index: 1, kind: output, shape index: {}]  }
   0x1   :  { %v4_v0 = vld [vmem:[%s117_s0] sm:$0x3]  ;;  %s65_s0 = smov 127   ;;  %s68_s10 = smov 126  }
   0x2   :  { %5 = vst [vmem:[#allocation0] sm:$0x3] %v4_v0  ;;  %s69_s11 = smov 124   ;;  %s70_s12 = smov 122  }
   0x3   :  { %s71_s13 = smov 121  }
   0x9   :  { %v9_v1 = vld [vmem:[#allocation0] sm:$0x3]  }
   0xa   :  { %v21_v2 = vld [vmem:[#allocation0] sm:$0x3]   ;;  %10 = vrot.lane.b32.xlu0 %v9_v1, %s65_s0 }
   0xb   :  { %22 = vrot.lane.b32.xlu1 %v21_v2, %s66_s8  ;;  %v33_v3 = vld [vmem:[#allocation0] sm:$0x3]  }
   0xc   :  { %34 = vrot.lane.b32.xlu2 %v33_v3, %s67_s9  ;;  %v15_v4 = vld [vmem:[#allocation0] sm:$0x3]  }
   0xd   :  { %v27_v5 = vld [vmem:[#allocation0] sm:$0x3]  }
   0xe   :  { %v39_v6 = vld [vmem:[#allocation0] sm:$0x3]  }
   0xf   :  { %v45_v7 = vld [vmem:[#allocation0] sm:$0x3]  }
  0x10   :  { %v6_v8 = vld [vmem:[#allocation0] sm:$0x3]  }
  0x11   :  { %8 = vst.msk [vmem:[%s118_s1] ss:$8 sm:$0x3] %vm7_vm0, %v6_v8  }
  0x12   :  { %16 = vrot.lane.b32.xlu0 %v15_v4, %s68_s10 }
  0x13   :  { %28 = vrot.lane.b32.xlu1 %v27_v5, %s69_s11 }
  0x14   :  { %40 = vrot.lane.b32.xlu2 %v39_v6, %s70_s12 }
  0x1a   :  { %46 = vrot.lane.b32.xlu0 %v45_v7, %s71_s13 }
  0x66   :  { %v35_v9 = vpop.permute.xlu2 %34  }
  0x67   :  { %55 = vst.msk [vmem:[%s118_s1 + $0x5] ss:$8 sm:$0x3] %vm7_vm0, %v35_v9  }
  0x6e   :  { %v41_v10 = vpop.permute.xlu2 %40  }
  0x6f   :  { %56 = vst.msk [vmem:[%s118_s1 + $0x6] ss:$8 sm:$0x3] %vm7_vm0, %v41_v10  }
  0x7c   :  { %v11_v11 = vpop.permute.xlu0 %10  }
  0x7d   :  { %v23_v12 = vpop.permute.xlu1 %22   ;;  %51 = vst.msk [vmem:[%s118_s1 + $0x1] ss:$8 sm:$0x3] %vm7_vm0, %v11_v11  }
  0x7e   :  { %53 = vst.msk [vmem:[%s118_s1 + $0x3] ss:$8 sm:$0x3] %vm7_vm0, %v23_v12  }
  0x84   :  { %v17_v13 = vpop.permute.xlu0 %16  }
  0x85   :  { %v29_v14 = vpop.permute.xlu1 %28   ;;  %52 = vst.msk [vmem:[%s118_s1 + $0x2] ss:$8 sm:$0x3] %vm7_vm0, %v17_v13  }
  0x86   :  { %54 = vst.msk [vmem:[%s118_s1 + $0x4] ss:$8 sm:$0x3] %vm7_vm0, %v29_v14  }
  0x8c   :  { %v47_v15 = vpop.permute.xlu0 %46  }
  0x8d   :  { %57 = vst.msk [vmem:[%s118_s1 + $0x7] ss:$8 sm:$0x3] %vm7_vm0, %v47_v15  }

// kernel: single_conv_forward.1
= control target key start
LH: loop header
LB: loop body
LE: loop exit
PB: predicated region body
PF: predicated region fallthrough
CT: control target
= control target key end

     0   :  { %s264_s17 = smov 112   ;;  %s265_s18 = smov 111   ;;  %v27_v3 = vlaneseq  ;;  %v272_v41 = vmov 0   ;;  %vm163_vm8 = vcmask 588800   ;;  %s392_s0 = inlined_call_operand.vmem [shape: f32[8,256], index: 0, kind: input, shape index: {}]   ;;  %s393_s3 = inlined_call_operand.vmem [shape: f32[9,256], index: 3, kind: input, shape index: {}]   ;;  %s394_s2 = inlined_call_operand.vmem [shape: f32[16,1], index: 2, kind: input, shape index: {}]   ;;  %s395_s1 = inlined_call_operand.vmem [shape: f32[16,72], index: 1, kind: input, shape index: {}]   ;;  %s396_s4 = inlined_call_operand.vmem [shape: f32[16,256], index: 4, kind: output, shape index: {}]  }
   0x1   :  { %v301_v0 = vld [vmem:[%s392_s0] sm:$0xff]  ;;  %s266_s19 = smov 113   ;;  %v309_v1 = vld [vmem:[%s392_s0 + $0x8] sm:$0xff]  ;;  %s267_s22 = smov 127   ;;  %v262_v10 = vld [vmem:[%s393_s3 + $0x10] ss:$0 sm:$0xff]  ;;  %259 = vset.pattern.permute.xlu1 %v272_v41  ;;  %260 = vset.pattern.permute.xlu2 %v272_v41 }
   0x2   :  { %105 = vrot.lane.b32.xlu1 %v301_v0, %s264_s17  ;;  %118 = vrot.lane.b32.xlu0 %v301_v0, %s265_s18  ;;  %s268_s23 = smov 1   ;;  %s269_s24 = smov 15   ;;  %v324_v6 = vand.u32 127, %v27_v3  ;;  %v330_v8 = vld [vmem:[%s393_s3] sm:$0xff]  ;;  %v336_v9 = vld [vmem:[%s393_s3 + $0x8] sm:$0xff] }
   0x3   :  { %92 = vrot.lane.b32.xlu2 %v301_v0, %s266_s19  ;;  %s270_s0 = smov 16   ;;  %s271_s25 = smov 17   ;;  %v263_v11 = vld [vmem:[%s393_s3 + $0x18] ss:$0 sm:$0xff]  ;;  %v112_v14 = vperm.slane %v330_v8, 7  ;;  %v113_v18 = vperm.slane %v336_v9, 7  ;;  %261 = vset.pattern.permute.xlu0 %v272_v41 }
   0x4   :  { %vm109_vm0 = vcmp.lt.s32.totalorder %v324_v6, 112  ;;  %vm122_vm1 = vcmp.lt.s32.totalorder %v324_v6, 111  ;;  %vm96_vm2 = vcmp.lt.s32.totalorder %v324_v6, 113  ;;  %v99_v22 = vperm.slane %v330_v8, 6  ;;  %v151_v35 = vld [vmem:[%s394_s2] sm:$0xff]  ;;  %v152_v36 = vld [vmem:[%s394_s2 + $0x8] sm:$0xff] }
   0x5   :  { %v100_v24 = vperm.slane %v336_v9, 6  ;;  %vm83_vm3 = vcmp.lt.s32.totalorder %v324_v6, 127  ;;  %v86_v30 = vperm.slane %v330_v8, 5  ;;  %v87_v31 = vperm.slane %v336_v9, 5 }
   0x6   :  { %vm68_vm4 = vcmp.lt.s32.totalorder %v324_v6, 1  ;;  %v71_v42 = vperm.slane %v330_v8, 3  ;;  %v72_v43 = vperm.slane %v336_v9, 3  ;;  %vm55_vm5 = vcmp.lt.s32.totalorder %v324_v6, 15 }
   0x7   :  { %v58_v45 = vperm.slane %v330_v8, 2  ;;  %v59_v46 = vperm.slane %v336_v9, 2  ;;  %vm42_vm6 = vcmp.lt.s32.totalorder %v324_v6, 16  ;;  %v45_v57 = vperm.slane %v330_v8, 1 }
   0x8   :  { %v46_v58 = vperm.slane %v336_v9, 1  ;;  %vm29_vm7 = vcmp.lt.s32.totalorder %v324_v6, 17  ;;  %v33_v3 = vperm.slane %v336_v9, 0  ;;  %v131_v6 = vld [vmem:[%s395_s1] sm:$0xff] }
   0xa   :  { %107 = vrot.lane.b32.xlu1 %v309_v1, %s264_s17  ;;  %120 = vrot.lane.b32.xlu0 %v309_v1, %s265_s18 }
   0xb   :  { %94 = vrot.lane.b32.xlu2 %v309_v1, %s266_s19 }
  0x12   :  { %81 = vrot.lane.b32.xlu1 %v309_v1, %s267_s22  ;;  %79 = vrot.lane.b32.xlu0 %v301_v0, %s267_s22 }
  0x13   :  { %64 = vrot.lane.b32.xlu2 %v301_v0, %s268_s23 }
  0x1a   :  { %51 = vrot.lane.b32.xlu1 %v301_v0, %s269_s24  ;;  %66 = vrot.lane.b32.xlu0 %v309_v1, %s268_s23 }
  0x1b   :  { %53 = vrot.lane.b32.xlu2 %v309_v1, %s269_s24 }
  0x22   :  { %40 = vrot.lane.b32.xlu1 %v309_v1, %s270_s0  ;;  %38 = vrot.lane.b32.xlu0 %v301_v0, %s270_s0 }
  0x23   :  { %23 = vrot.lane.b32.xlu2 %v301_v0, %s271_s25 }
  0x2a   :  { %25 = vrot.lane.b32.xlu0 %v309_v1, %s271_s25  ;;  %155 = vperm.xlu1 %259, %v151_v35  }
  0x2b   :  { %160 = vperm.xlu2 %260, %v152_v36  }
  0x5d   :  { %v93_v2 = vpop.permute.xlu2 %92 }
  0x65   :  { %v95_v7 = vpop.permute.xlu2 %94 }
  0x66   :  { %v97_v23 = vsel %vm96_vm2, %v93_v2, %v95_v7  ;;  %v98_v25 = vsel %vm96_vm2, %v95_v7, %v93_v2  ;;  %v32_v2 = vperm.slane %v330_v8, 0 }
  0x67   :  { %v101_v29 = vmul.f32 %v99_v22, %v97_v23  ;;  %v102_v32 = vmul.f32 %v100_v24, %v98_v25 }
  0x6d   :  { %v65_v27 = vpop.permute.xlu2 %64 }
  0x74   :  { %v106_v4 = vpop.permute.xlu1 %105  ;;  %v119_v5 = vpop.permute.xlu0 %118 }
  0x75   :  { %v54_v44 = vpop.permute.xlu2 %53 }
  0x7c   :  { %v108_v12 = vpop.permute.xlu1 %107  ;;  %v121_v13 = vpop.permute.xlu0 %120 }
  0x7d   :  { %v110_v15 = vsel %vm109_vm0, %v106_v4, %v108_v12  ;;  %v123_v16 = vsel %vm122_vm1, %v119_v5, %v121_v13  ;;  %v124_v17 = vsel %vm122_vm1, %v121_v13, %v119_v5  ;;  %v111_v19 = vsel %vm109_vm0, %v108_v12, %v106_v4  ;;  %v132_v12 = vld [vmem:[%s395_s1 + $0x8] sm:$0xff] }
  0x7e   :  { %v127_v20 = vmul.f32 %v262_v10, %v123_v16  ;;  %v128_v21 = vmul.f32 %v263_v11, %v124_v17  ;;  %v114_v26 = vmul.f32 %v112_v14, %v110_v15  ;;  %v115_v28 = vmul.f32 %v113_v18, %v111_v19 }
  0x80   :  { %177 = vmatpush.msra.mxu0 %v127_v20  ;;  %232 = vmatpush.msra.mxu2 %v127_v20 }
  0x81   :  { %200 = vmatpush.msra.mxu1 %v128_v21  ;;  %241 = vmatpush.msra.mxu3 %v128_v21 }
  0x82   :  { %178 = vmatpush.msra.mxu0 %v114_v26  ;;  %233 = vmatpush.msra.mxu2 %v114_v26 }
  0x83   :  { %201 = vmatpush.msra.mxu1 %v115_v28  ;;  %242 = vmatpush.msra.mxu3 %v115_v28 }
  0x84   :  { %v82_v33 = vpop.permute.xlu1 %81  ;;  %179 = vmatpush.msra.mxu0 %v101_v29  ;;  %234 = vmatpush.msra.mxu2 %v101_v29  ;;  %v80_v34 = vpop.permute.xlu0 %79 }
  0x85   :  { %202 = vmatpush.msra.mxu1 %v102_v32  ;;  %243 = vmatpush.msra.mxu3 %v102_v32  ;;  %v84_v37 = vsel %vm83_vm3, %v80_v34, %v82_v33  ;;  %v85_v38 = vsel %vm83_vm3, %v82_v33, %v80_v34 }
  0x86   :  { %v88_v39 = vmul.f32 %v86_v30, %v84_v37  ;;  %v89_v40 = vmul.f32 %v87_v31, %v85_v38 }
  0x88   :  { %180 = vmatpush.msra.mxu0 %v88_v39  ;;  %235 = vmatpush.msra.mxu2 %v88_v39 }
  0x89   :  { %203 = vmatpush.msra.mxu1 %v89_v40  ;;  %244 = vmatpush.msra.mxu3 %v89_v40 }
  0x8a   :  { %181 = vmatpush.msra.mxu0 %v301_v0  ;;  %236 = vmatpush.msra.mxu2 %v301_v0 }
  0x8b   :  { %204 = vmatpush.msra.mxu1 %v309_v1  ;;  %245 = vmatpush.msra.mxu3 %v309_v1  ;;  %v24_v1 = vpop.permute.xlu2 %23 }
  0x8c   :  { %v52_v47 = vpop.permute.xlu1 %51  ;;  %v67_v48 = vpop.permute.xlu0 %66 }
  0x8d   :  { %v69_v49 = vsel %vm68_vm4, %v65_v27, %v67_v48  ;;  %v70_v50 = vsel %vm68_vm4, %v67_v48, %v65_v27  ;;  %v56_v51 = vsel %vm55_vm5, %v52_v47, %v54_v44  ;;  %v57_v52 = vsel %vm55_vm5, %v54_v44, %v52_v47 }
  0x8e   :  { %v73_v53 = vmul.f32 %v71_v42, %v70_v50  ;;  %v74_v54 = vmul.f32 %v72_v43, %v69_v49  ;;  %v60_v55 = vmul.f32 %v58_v45, %v57_v52  ;;  %v61_v56 = vmul.f32 %v59_v46, %v56_v51 }
  0x90   :  { %182 = vmatpush.msra.mxu0 %v73_v53  ;;  %237 = vmatpush.msra.mxu2 %v73_v53 }
  0x91   :  { %205 = vmatpush.msra.mxu1 %v74_v54  ;;  %246 = vmatpush.msra.mxu3 %v74_v54 }
  0x92   :  { %183 = vmatpush.msra.mxu0 %v60_v55  ;;  %238 = vmatpush.msra.mxu2 %v60_v55 }
  0x93   :  { %206 = vmatpush.msra.mxu1 %v61_v56  ;;  %247 = vmatpush.msra.mxu3 %v61_v56  ;;  %v161_v16 = vpop.permute.xlu2 %160 }
  0x94   :  { %v41_v59 = vpop.permute.xlu1 %40  ;;  %v39_v60 = vpop.permute.xlu0 %38 }
  0x95   :  { %v43_v61 = vsel %vm42_vm6, %v39_v60, %v41_v59  ;;  %v44_v62 = vsel %vm42_vm6, %v41_v59, %v39_v60 }
  0x96   :  { %v47_v63 = vmul.f32 %v45_v57, %v44_v62  ;;  %v48_v0 = vmul.f32 %v46_v58, %v43_v61 }
  0x98   :  { %184 = vmatpush.msra.mxu0 %v47_v63  ;;  %239 = vmatpush.msra.mxu2 %v47_v63 }
  0x99   :  { %207 = vmatpush.msra.mxu1 %v48_v0  ;;  %248 = vmatpush.msra.mxu3 %v48_v0 }
  0x9c   :  { %v26_v4 = vpop.permute.xlu0 %25  ;;  %v156_v8 = vpop.permute.xlu1 %155 }
  0x9d   :  { %v30_v5 = vsel %vm29_vm7, %v24_v1, %v26_v4  ;;  %v31_v7 = vsel %vm29_vm7, %v26_v4, %v24_v1 }
  0x9e   :  { %v34_v10 = vmul.f32 %v32_v2, %v31_v7  ;;  %v35_v11 = vmul.f32 %v33_v3, %v30_v5 }
  0xa0   :  { %185 = vmatpush.msra.mxu0 %v34_v10  ;;  %240 = vmatpush.msra.mxu2 %v34_v10 }
  0xa1   :  { %208 = vmatpush.msra.mxu1 %v35_v11  ;;  %249 = vmatpush.msra.mxu3 %v35_v11 }
  0xa2   :  { %229 = vmatmul.msk.f32.vlgmr.msra.gmra.mxu2 %vm163_vm8, %v132_v12  ;;  %231 = vmatmul.msk.f32.vlgmr.msra.gmra.mxu3 %vm163_vm8, %v132_v12 }
  0xa3   :  { %228 = vmatmul.msk.f32.vlgmr.msra.gmra.mxu0 %vm163_vm8, %v131_v6  ;;  %230 = vmatmul.msk.f32.vlgmr.msra.gmra.mxu1 %vm163_vm8, %v131_v6 }
 0x120   :  { %v187_v9 = vpop.f32.mrf.mxu0  ;;  %v210_v13 = vpop.f32.mrf.mxu1 }
 0x121   :  { %v188_v14 = vadd.f32 %v187_v9, %v156_v8  ;;  %v211_v15 = vadd.f32 %v210_v13, %v156_v8 }
 0x123   :  { %v216_v17 = vmax.f32 %v188_v14, 0.0  ;;  %v217_v18 = vmax.f32 %v211_v15, 0.0 }
 0x125   :  { %220 = vst [vmem:[%s396_s4] sm:$0xff] %v216_v17  ;;  %v190_v19 = vpop.f32.mrf.mxu2  ;;  %v213_v20 = vpop.f32.mrf.mxu3 }
 0x126   :  { %v191_v21 = vadd.f32 %v190_v19, %v161_v16  ;;  %221 = vst [vmem:[%s396_s4 + $0x8] sm:$0xff] %v217_v18  ;;  %v214_v22 = vadd.f32 %v213_v20, %v161_v16 }
 0x128   :  { %v218_v23 = vmax.f32 %v191_v21, 0.0  ;;  %v219_v24 = vmax.f32 %v214_v22, 0.0 }
 0x12a   :  { %222 = vst [vmem:[%s396_s4 + $0x10] sm:$0xff] %v218_v23 }
 0x12b   :  { %223 = vst [vmem:[%s396_s4 + $0x18] sm:$0xff] %v219_v24 }

</bundles_post_ra>
